<compile_context>
chip_gen: v7x
topology: tpu7x:2x2x1
jax: 0.10.0
libtpu: 0.0.40
codegen_flags: <defaults>
</compile_context>

<pallas_src>
import functools

import jax
import jax.numpy as jnp
from jax.experimental import pallas as pl
from jax.experimental.pallas import tpu as pltpu


def _cdiv(a, b):
    return -(-a // b)


def _pool_fc_kernel(hidden_ref,   # (bt, st, H) VMEM  encoder hidden tile (native dtype)
                    w_ref,        # (H, 2)      VMEM  [att_w | fc1 hidden weight] (hidden dtype)
                    tail_ref,     # (bt, 1)     VMEM  task*w_t + grade*w_g + fc1 bias (f32)
                    scal_ref,     # (1, 1)      SMEM  attention bias
                    out_ref,      # (bt, 1)     VMEM  sigmoid(fc1(...))
                    m_sc,         # (bt, 1)     VMEM f32 scratch: running max
                    l_sc,         # (bt, 1)     VMEM f32 scratch: running softmax denom
                    acc_sc,       # (bt, 1)     VMEM f32 scratch: running sum_s p_s * proj_s
                    *, seq_len, seq_padded):
    s_idx = pl.program_id(1)

    @pl.when(s_idx == 0)
    def _init():
        m_sc[...] = jnp.full_like(m_sc, -1e30)
        l_sc[...] = jnp.zeros_like(l_sc)
        acc_sc[...] = jnp.zeros_like(acc_sc)

    x = hidden_ref[...]                                   # (bt, st, H) native dtype (bf16 OK)
    bt, st, H = x.shape
    w = w_ref[...]                                        # (H, 2), already in x.dtype

    # Single MXU pass over the tile: column 0 -> attention score, column 1 -> fc1 projection.
    both = jnp.dot(x.reshape(bt * st, H), w,
                   preferred_element_type=jnp.float32).reshape(bt, st, 2)
    scores = both[:, :, 0] + scal_ref[0, 0]               # (bt, st) attention scores + bias
    proj = both[:, :, 1]                                  # (bt, st) per-token fc1 projection

    if seq_padded:  # static python flag: only emitted when S was padded to a tile multiple
        pos = s_idx * st + jax.lax.broadcasted_iota(jnp.int32, (1, st), 1)
        valid = pos < seq_len
        scores = jnp.where(valid, scores, -1e30)
        proj = jnp.where(valid, proj, 0.0)

    # Online (flash-style) softmax over the sequence axis, fused with the fc1 hidden dot:
    #   emb @ fc_w_h = sum_s softmax_s * proj_s = acc / l
    m_prev = m_sc[...]                                    # (bt, 1)
    m_new = jnp.maximum(m_prev, jnp.max(scores, axis=-1, keepdims=True))
    alpha = jnp.exp(m_prev - m_new)                       # rescale of previous partials
    p = jnp.exp(scores - m_new)                           # (bt, st)
    if seq_padded:
        p = jnp.where(valid, p, 0.0)

    l_sc[...] = alpha * l_sc[...] + jnp.sum(p, axis=-1, keepdims=True)
    acc_sc[...] = alpha * acc_sc[...] + jnp.sum(p * proj, axis=-1, keepdims=True)
    m_sc[...] = m_new

    @pl.when(s_idx == pl.num_programs(1) - 1)
    def _finalize():
        logit = acc_sc[...] / l_sc[...] + tail_ref[...]   # (bt, 1)
        out_ref[...] = jax.nn.sigmoid(logit)


def custom_model_forward(last_hidden_state, task_ids, grade_ids,
                         att_w, att_b, fc_w, fc_b,
                         *, b_tile=None, s_tile=None,
                         hidden_tile_bytes=8 * 1024 * 1024):
    """last_hidden_state: (B, S, H), any float dtype (streamed from HBM in its native dtype).
    task_ids/grade_ids: (B,). att_w: (H,), att_b: (1,), fc_w: (H+2,), fc_b: (1,).
    Returns (B,) f32 — matches CustomModel.forward output (eval mode)."""
    B, S, H = last_hidden_state.shape
    dt = last_hidden_state.dtype
    dt_bytes = jnp.dtype(dt).itemsize
    sub_align = max(8, 32 // dt_bytes)        # sublane packing: f32 -> 8, bf16 -> 16, int8 -> 32

    # ---- batch tiling ------------------------------------------------------
    # b_tile = 8 when B >= 16: >= 2 parallel blocks (v7x has 2 TensorCores) while keeping the
    # (B, 1) output/tail blocks legal under the (8, 128) rule. Small B -> one full block.
    if b_tile is None:
        b_tile = 8 if B >= 16 else B
    n_b = _cdiv(B, b_tile)
    B_pad = n_b * b_tile

    # ---- sequence tiling ---------------------------------------------------
    # Target ~hidden_tile_bytes per hidden block (bandwidth-bound kernel), then snap the tile
    # so padding is minimized and the second-minor dim is sublane-packing aligned.
    if s_tile is None:
        target_rows = max(sub_align, hidden_tile_bytes // max(1, b_tile * H * dt_bytes))
        n_s = max(1, _cdiv(S, target_rows))
        s_tile = _cdiv(_cdiv(S, n_s), sub_align) * sub_align
    else:
        s_tile = max(sub_align, _cdiv(s_tile, sub_align) * sub_align)
        s_tile = min(s_tile, _cdiv(S, sub_align) * sub_align)
    n_s = _cdiv(S, s_tile)
    S_pad = n_s * s_tile

    hidden = last_hidden_state                # keep native dtype (bf16 halves HBM bytes)
    if (B_pad, S_pad) != (B, S):
        hidden = jnp.pad(hidden, ((0, B_pad - B), (0, S_pad - S), (0, 0)))

    # Fused stationary weight (H, 2): col 0 = attention weight, col 1 = fc1 hidden weight.
    w_packed = jnp.concatenate([att_w.reshape(H, 1), fc_w[:H].reshape(H, 1)],
                               axis=1).astype(dt)
    # Per-row scalar tail of fc1: task*w_task + grade*w_grade + fc1 bias (exact, f32).
    tail = (task_ids.astype(jnp.float32) * fc_w[H]
            + grade_ids.astype(jnp.float32) * fc_w[H + 1]
            + fc_b.reshape(())).reshape(B, 1).astype(jnp.float32)
    if B_pad != B:
        tail = jnp.pad(tail, ((0, B_pad - B), (0, 0)))
    # Attention bias (softmax is shift-invariant, kept for fidelity with the module).
    scal = att_b.reshape(1, 1).astype(jnp.float32)

    kernel = functools.partial(_pool_fc_kernel, seq_len=S, seq_padded=(S_pad != S))

    grid_spec = pltpu.PrefetchScalarGridSpec(
        num_scalar_prefetch=0,
        grid=(n_b, n_s),
        in_specs=[
            pl.BlockSpec((b_tile, s_tile, H), lambda b, s: (b, s, 0)),    # hidden tiles
            pl.BlockSpec((H, 2), lambda b, s: (0, 0)),                    # fused [att_w | fc_w_h]
            pl.BlockSpec((b_tile, 1), lambda b, s: (b, 0)),               # fc1 scalar tail per row
            pl.BlockSpec((1, 1), lambda b, s: (0, 0),
                         memory_space=pltpu.MemorySpace.SMEM),            # attention bias
        ],
        out_specs=pl.BlockSpec((b_tile, 1), lambda b, s: (b, 0)),
        scratch_shapes=[
            pltpu.VMEM((b_tile, 1), jnp.float32),   # running max
            pltpu.VMEM((b_tile, 1), jnp.float32),   # running softmax denom
            pltpu.VMEM((b_tile, 1), jnp.float32),   # running sum_s p_s * (h_s . fc_w_h)
        ],
    )

    # ---- VMEM budget: derive from the actual chip (v7x has only 64 MiB physical) ----
    hid_block_bytes = b_tile * s_tile * H * dt_bytes
    try:
        vmem_cap = int(pltpu.get_tpu_info().vmem_capacity_bytes)
    except Exception:
        vmem_cap = 64 * 1024 * 1024                       # conservative (v7x-sized) fallback
    vmem_limit = min(int(0.75 * vmem_cap),                # <= 48 MiB on v7x, <= 96 MiB on v5e/v6e
                     2 * hid_block_bytes + 32 * 1024 * 1024)

    cost = pl.CostEstimate(
        flops=int(4 * B_pad * S_pad * H + 8 * B_pad * S_pad),
        transcendentals=int(B_pad * S_pad + 4 * B_pad * n_s),
        bytes_accessed=int(B_pad * S_pad * H * dt_bytes + 2 * H * dt_bytes
                           + 2 * B_pad * 4 + 4))

    out = pl.pallas_call(
        kernel,
        out_shape=jax.ShapeDtypeStruct((B_pad, 1), jnp.float32),
        grid_spec=grid_spec,
        compiler_params=pltpu.CompilerParams(
            dimension_semantics=("parallel", "arbitrary"),   # batch across TCs, seq = reduction
            vmem_limit_bytes=int(vmem_limit)),
        cost_estimate=cost,
    )(hidden, w_packed, tail, scal)

    return out[:B, 0]  # matches `.sigmoid()[:, 0]`


def _reference_forward(hidden, task_ids, grade_ids, att_w, att_b, fc_w, fc_b):
    hp = jax.lax.Precision.HIGHEST
    h = hidden.astype(jnp.float32)
    scores = jnp.einsum('bsh,h->bs', h, att_w, precision=hp) + att_b[0]
    w = jax.nn.softmax(scores, axis=-1)
    emb = jnp.einsum('bs,bsh->bh', w, h, precision=hp)
    feat = jnp.concatenate(
        [emb, jnp.stack([task_ids, grade_ids], -1).astype(jnp.float32)], axis=-1)
    return jax.nn.sigmoid(jnp.dot(feat, fc_w, precision=hp) + fc_b[0])


if __name__ == "__main__":
    def make_inputs(key, B, S, H, dtype):
        ks = jax.random.split(key, 5)
        # synthetic encoder output (stand-in for Whisper encoder last_hidden_state)
        hidden = jax.random.normal(ks[0], (B, S, H), dtype=jnp.float32).astype(dtype)
        task_ids = jax.random.randint(ks[1], (B,), 0, 5).astype(jnp.float32)
        grade_ids = jax.random.randint(ks[2], (B,), 0, 10).astype(jnp.float32)
        # N(0, 0.02) weights per _init_weights; small non-zero biases to exercise the bias path
        att_w = 0.02 * jax.random.normal(ks[3], (H,), dtype=jnp.float32)
        att_b = jnp.array([0.05], dtype=jnp.float32)
        fc_w = 0.02 * jax.random.normal(ks[4], (H + 2,), dtype=jnp.float32)
        fc_b = jnp.array([-0.1], dtype=jnp.float32)
        return hidden, task_ids, grade_ids, att_w, att_b, fc_w, fc_b

    key = jax.random.PRNGKey(0)
    k1, k2, k3 = jax.random.split(key, 3)

    # Test 1: small f32 hidden (B=2, S=8, H=32), single-tile path.
    args1 = make_inputs(k1, 2, 8, 32, jnp.float32)
    out1 = jax.block_until_ready(custom_model_forward(*args1))
    ref1 = _reference_forward(*args1)
    assert out1.shape == (2,) and out1.dtype == jnp.float32
    # tolerance covers MXU default-precision (bf16 pass) vs the f32 HIGHEST-precision reference
    assert jnp.allclose(out1, ref1, atol=2e-3, rtol=2e-3), (out1, ref1)

    # Test 2: bf16 hidden, S not a multiple of the tile (mask path), multi-step online softmax.
    args2 = make_inputs(k2, 3, 20, 32, jnp.bfloat16)
    out2 = jax.block_until_ready(custom_model_forward(*args2, s_tile=16))
    ref2 = _reference_forward(*args2)
    assert out2.shape == (3,) and out2.dtype == jnp.float32
    assert jnp.allclose(out2, ref2, atol=5e-3, rtol=5e-3), (out2, ref2)

    # Test 3: B >= 16 exercises the 2-block parallel batch axis (b_tile = 8).
    args3 = make_inputs(k3, 16, 80, 128, jnp.bfloat16)
    out3 = jax.block_until_ready(custom_model_forward(*args3))
    ref3 = _reference_forward(*args3)
    assert out3.shape == (16,) and out3.dtype == jnp.float32
    assert jnp.allclose(out3, ref3, atol=5e-3, rtol=5e-3), (out3, ref3)

    print("KERNEL_OK")
</pallas_src>

<mosaic_0001>
module attributes {stable_mosaic.version = 11 : i64} {
  func.func @_pool_fc_kernel(%arg0: i32, %arg1: i32, %arg2: memref<2x8x32xf32, #tpu.memory_space<vmem>>, %arg3: memref<32x2xf32, #tpu.memory_space<vmem>>, %arg4: memref<2x1xf32, #tpu.memory_space<vmem>>, %arg5: memref<1x1xf32, #tpu.memory_space<smem>>, %arg6: memref<2x1xf32, #tpu.memory_space<vmem>>, %arg7: memref<2x1xf32, #tpu.memory_space<vmem>>, %arg8: memref<2x1xf32, #tpu.memory_space<vmem>>, %arg9: memref<2x1xf32, #tpu.memory_space<vmem>>) attributes {dimension_semantics = [#tpu.dimension_semantics<parallel>, #tpu.dimension_semantics<arbitrary>], iteration_bounds = array<i64: 1, 1>, scalar_prefetch = 0 : i64, scratch_operands = 3 : i64, tpu.core_type = #tpu.core_type<tc>, window_params = [{transform_indices = @transform_0, window_bounds = array<i64: 2, 8, 32>}, {pipeline_mode = #tpu.pipeline_mode<synchronous>, transform_indices = @transform_1, window_bounds = array<i64: 32, 2>}, {transform_indices = @transform_2, window_bounds = array<i64: 2, 1>}, {transform_indices = @transform_3, window_bounds = array<i64: 1, 1>}, {transform_indices = @transform_4, window_bounds = array<i64: 2, 1>}]} {
    %c0_i32 = arith.constant 0 : i32
    %0 = arith.cmpi eq, %arg1, %c0_i32 : i32
    %1 = arith.extui %0 : i1 to i32
    %c0_i32_0 = arith.constant 0 : i32
    %2 = arith.cmpi ne, %1, %c0_i32_0 : i32
    scf.if %2 {
      %cst_24 = arith.constant -1.000000e+30 : f32
      %41 = vector.broadcast %cst_24 : f32 to vector<2x1xf32>
      %c0_25 = arith.constant 0 : index
      %c0_26 = arith.constant 0 : index
      %42 = vector.load %arg7[%c0_25, %c0_26] : memref<2x1xf32, #tpu.memory_space<vmem>>, vector<2x1xf32>
      tpu.vector_store %arg7[%c0_25, %c0_26], %41 {strides = array<i32>} : memref<2x1xf32, #tpu.memory_space<vmem>>, vector<2x1xf32>,
      %cst_27 = arith.constant 0.000000e+00 : f32
      %43 = vector.broadcast %cst_27 : f32 to vector<2x1xf32>
      %c0_28 = arith.constant 0 : index
      %c0_29 = arith.constant 0 : index
      %44 = vector.load %arg8[%c0_28, %c0_29] : memref<2x1xf32, #tpu.memory_space<vmem>>, vector<2x1xf32>
      tpu.vector_store %arg8[%c0_28, %c0_29], %43 {strides = array<i32>} : memref<2x1xf32, #tpu.memory_space<vmem>>, vector<2x1xf32>,
      %cst_30 = arith.constant 0.000000e+00 : f32
      %45 = vector.broadcast %cst_30 : f32 to vector<2x1xf32>
      %c0_31 = arith.constant 0 : index
      %c0_32 = arith.constant 0 : index
      %46 = vector.load %arg9[%c0_31, %c0_32] : memref<2x1xf32, #tpu.memory_space<vmem>>, vector<2x1xf32>
      tpu.vector_store %arg9[%c0_31, %c0_32], %45 {strides = array<i32>} : memref<2x1xf32, #tpu.memory_space<vmem>>, vector<2x1xf32>,
    } else {
    }
    %c0 = arith.constant 0 : index
    %c0_1 = arith.constant 0 : index
    %c0_2 = arith.constant 0 : index
    %3 = vector.load %arg2[%c0, %c0_1, %c0_2] : memref<2x8x32xf32, #tpu.memory_space<vmem>>, vector<2x8x32xf32>
    %c0_3 = arith.constant 0 : index
    %c0_4 = arith.constant 0 : index
    %4 = vector.load %arg3[%c0_3, %c0_4] : memref<32x2xf32, #tpu.memory_space<vmem>>, vector<32x2xf32>
    %5 = vector.shape_cast %3 : vector<2x8x32xf32> to vector<16x32xf32>
    %cst = arith.constant dense<0.000000e+00> : vector<16x2xf32>
    %6 = tpu.matmul %5, %4, %cst {dimension_numbers = #tpu.dot_dimension_numbers<[1], [0], [0], [1], [0, 0, 1, 1], [], []>} : vector<16x32xf32>, vector<32x2xf32>, vector<16x2xf32> -> vector<16x2xf32>
    %7 = vector.shape_cast %6 : vector<16x2xf32> to vector<2x8x2xf32>
    %8 = vector.extract_strided_slice %7 {offsets = [0, 0, 0], sizes = [2, 8, 1], strides = [1, 1, 1]} : vector<2x8x2xf32> to vector<2x8x1xf32>
    %9 = vector.shape_cast %8 : vector<2x8x1xf32> to vector<2x8xf32>
    %c0_5 = arith.constant 0 : index
    %c0_6 = arith.constant 0 : index
    %10 = memref.load %arg5[%c0_5, %c0_6] : memref<1x1xf32, #tpu.memory_space<smem>>
    %11 = vector.broadcast %10 : f32 to vector<2x8xf32>
    %12 = arith.addf %9, %11 : vector<2x8xf32>
    %13 = vector.extract_strided_slice %7 {offsets = [0, 0, 1], sizes = [2, 8, 1], strides = [1, 1, 1]} : vector<2x8x2xf32> to vector<2x8x1xf32>
    %14 = vector.shape_cast %13 : vector<2x8x1xf32> to vector<2x8xf32>
    %c0_7 = arith.constant 0 : index
    %c0_8 = arith.constant 0 : index
    %15 = vector.load %arg7[%c0_7, %c0_8] : memref<2x1xf32, #tpu.memory_space<vmem>>, vector<2x1xf32>
    %cst_9 = arith.constant dense<0xFF800000> : vector<2xf32>
    %16 = vector.multi_reduction <maximumf>, %12, %cst_9 [1] : vector<2x8xf32> to vector<2xf32>
    %17 = vector.shape_cast %16 : vector<2xf32> to vector<2x1xf32>
    %18 = arith.maximumf %15, %17 : vector<2x1xf32>
    %19 = arith.subf %15, %18 : vector<2x1xf32>
    %20 = math.exp %19 : vector<2x1xf32>
    %21 = vector.broadcast %18 : vector<2x1xf32> to vector<2x8xf32>
    %22 = arith.subf %12, %21 : vector<2x8xf32>
    %23 = math.exp %22 : vector<2x8xf32>
    %c0_10 = arith.constant 0 : index
    %c0_11 = arith.constant 0 : index
    %24 = vector.load %arg8[%c0_10, %c0_11] : memref<2x1xf32, #tpu.memory_space<vmem>>, vector<2x1xf32>
    %25 = arith.mulf %20, %24 : vector<2x1xf32>
    %cst_12 = arith.constant dense<0.000000e+00> : vector<2xf32>
    %26 = vector.multi_reduction <add>, %23, %cst_12 [1] : vector<2x8xf32> to vector<2xf32>
    %27 = vector.shape_cast %26 : vector<2xf32> to vector<2x1xf32>
    %28 = arith.addf %25, %27 : vector<2x1xf32>
    %c0_13 = arith.constant 0 : index
    %c0_14 = arith.constant 0 : index
    %29 = vector.load %arg8[%c0_13, %c0_14] : memref<2x1xf32, #tpu.memory_space<vmem>>, vector<2x1xf32>
    tpu.vector_store %arg8[%c0_13, %c0_14], %28 {strides = array<i32>} : memref<2x1xf32, #tpu.memory_space<vmem>>, vector<2x1xf32>,
    %c0_15 = arith.constant 0 : index
    %c0_16 = arith.constant 0 : index
    %30 = vector.load %arg9[%c0_15, %c0_16] : memref<2x1xf32, #tpu.memory_space<vmem>>, vector<2x1xf32>
    %31 = arith.mulf %20, %30 : vector<2x1xf32>
    %32 = arith.mulf %23, %14 : vector<2x8xf32>
    %cst_17 = arith.constant dense<0.000000e+00> : vector<2xf32>
    %33 = vector.multi_reduction <add>, %32, %cst_17 [1] : vector<2x8xf32> to vector<2xf32>
    %34 = vector.shape_cast %33 : vector<2xf32> to vector<2x1xf32>
    %35 = arith.addf %31, %34 : vector<2x1xf32>
    %c0_18 = arith.constant 0 : index
    %c0_19 = arith.constant 0 : index
    %36 = vector.load %arg9[%c0_18, %c0_19] : memref<2x1xf32, #tpu.memory_space<vmem>>, vector<2x1xf32>
    tpu.vector_store %arg9[%c0_18, %c0_19], %35 {strides = array<i32>} : memref<2x1xf32, #tpu.memory_space<vmem>>, vector<2x1xf32>,
    %c0_20 = arith.constant 0 : index
    %c0_21 = arith.constant 0 : index
    %37 = vector.load %arg7[%c0_20, %c0_21] : memref<2x1xf32, #tpu.memory_space<vmem>>, vector<2x1xf32>
    tpu.vector_store %arg7[%c0_20, %c0_21], %18 {strides = array<i32>} : memref<2x1xf32, #tpu.memory_space<vmem>>, vector<2x1xf32>,
    %c0_i32_22 = arith.constant 0 : i32
    %38 = arith.cmpi eq, %arg1, %c0_i32_22 : i32
    %39 = arith.extui %38 : i1 to i32
    %c0_i32_23 = arith.constant 0 : i32
    %40 = arith.cmpi ne, %39, %c0_i32_23 : i32
    scf.if %40 {
      %c0_24 = arith.constant 0 : index
      %c0_25 = arith.constant 0 : index
      %41 = vector.load %arg9[%c0_24, %c0_25] : memref<2x1xf32, #tpu.memory_space<vmem>>, vector<2x1xf32>
      %c0_26 = arith.constant 0 : index
      %c0_27 = arith.constant 0 : index
      %42 = vector.load %arg8[%c0_26, %c0_27] : memref<2x1xf32, #tpu.memory_space<vmem>>, vector<2x1xf32>
      %43 = arith.divf %41, %42 : vector<2x1xf32>
      %c0_28 = arith.constant 0 : index
      %c0_29 = arith.constant 0 : index
      %44 = vector.load %arg4[%c0_28, %c0_29] : memref<2x1xf32, #tpu.memory_space<vmem>>, vector<2x1xf32>
      %45 = arith.addf %43, %44 : vector<2x1xf32>
      %46 = arith.negf %45 : vector<2x1xf32>
      %47 = math.exp %46 : vector<2x1xf32>
      %cst_30 = arith.constant 1.000000e+00 : f32
      %48 = vector.broadcast %cst_30 : f32 to vector<2x1xf32>
      %49 = arith.addf %48, %47 : vector<2x1xf32>
      %50 = arith.divf %48, %49 : vector<2x1xf32>
      %c0_31 = arith.constant 0 : index
      %c0_32 = arith.constant 0 : index
      %51 = vector.load %arg6[%c0_31, %c0_32] : memref<2x1xf32, #tpu.memory_space<vmem>>, vector<2x1xf32>
      tpu.vector_store %arg6[%c0_31, %c0_32], %50 {strides = array<i32>} : memref<2x1xf32, #tpu.memory_space<vmem>>, vector<2x1xf32>,
    } else {
    }
    return
  }
  func.func @transform_0(%arg0: i32, %arg1: i32) -> (i32, i32, i32) {
    %c0_i32 = arith.constant 0 : i32
    %c0_i32_0 = arith.constant 0 : i32
    return %arg0, %arg1, %c0_i32 : i32, i32, i32
  }
  func.func @transform_1(%arg0: i32, %arg1: i32) -> (i32, i32) {
    %c0_i32 = arith.constant 0 : i32
    %c0_i32_0 = arith.constant 0 : i32
    %c0_i32_1 = arith.constant 0 : i32
    return %c0_i32, %c0_i32_0 : i32, i32
  }
  func.func @transform_2(%arg0: i32, %arg1: i32) -> (i32, i32) {
    %c0_i32 = arith.constant 0 : i32
    %c0_i32_0 = arith.constant 0 : i32
    return %arg0, %c0_i32 : i32, i32
  }
  func.func @transform_3(%arg0: i32, %arg1: i32) -> (i32, i32) {
    %c0_i32 = arith.constant 0 : i32
    %c0_i32_0 = arith.constant 0 : i32
    %c0_i32_1 = arith.constant 0 : i32
    return %c0_i32, %c0_i32_0 : i32, i32
  }
  func.func @transform_4(%arg0: i32, %arg1: i32) -> (i32, i32) {
    %c0_i32 = arith.constant 0 : i32
    %c0_i32_0 = arith.constant 0 : i32
    return %arg0, %c0_i32 : i32, i32
  }
}

</mosaic_0001>

<bundles_post_ra>
// kernel: tpu_custom_call.1
= control target key start
LH: loop header
LB: loop body
LE: loop exit
PB: predicated region body
PF: predicated region fallthrough
CT: control target
= control target key end

     0   :  { %vm32_vm0 = vcmask 261120   ;;  %v296_v8 = vmov 0   ;;  %s297_s28 = smov 127   ;;  %vm22_vm1 = vcmask 1024   ;;  %v298_v14 = vmov -1e+30   ;;  %s365_s1 = inlined_call_operand.vmem [shape: f32[32,2], index: 1, kind: input, shape index: {}]   ;;  %s366_s0 = inlined_call_operand.vmem [shape: f32[2,8,32], index: 0, kind: input, shape index: {}]   ;;  %s367_s3 = inlined_call_operand.<no memory space> [shape: f32[1,1], index: 3, kind: input, shape index: {}]   ;;  %s368_s2 = inlined_call_operand.vmem [shape: f32[2,1], index: 2, kind: input, shape index: {}]   ;;  %s369_s4 = inlined_call_operand.vmem [shape: f32[2,1], index: 4, kind: output, shape index: {}]  }
   0x1   :  { %v28_v0 = vld [vmem:[%s365_s1] sm:$0xff]  ;;  %v29_v1 = vld [vmem:[%s365_s1 + $0x8] sm:$0xff]  ;;  %v30_v2 = vld [vmem:[%s365_s1 + $0x10] sm:$0xff]  ;;  %282 = vset.pattern.permute.xlu0 %v296_v8  ;;  %283 = vset.pattern.permute.xlu1 %v296_v8  ;;  %v115_v9 = vstv %s367_s3  ;;  %23 = vst.msk [vmem:[#allocation2] sm:$0x3] %vm22_vm1, %v298_v14  ;;  %v127_v15 = vlaneseq  ;;  %vm137_vm2 = vcmask 1041409  }
   0x2   :  { %v270_v3 = vpack.c.bf16 %v29_v1, %v28_v0  ;;  %v31_v4 = vld [vmem:[%s365_s1 + $0x18] sm:$0xff]  ;;  %v26_v5 = vld [vmem:[%s366_s0] sm:$0xff]  ;;  %v27_v7 = vld [vmem:[%s366_s0 + $0x8] sm:$0xff]  ;;  %vm140_vm3 = vcmask 58368   ;;  %v299_v25 = vmov 0.0  }
   0x3   :  { %v274_v6 = vpack.c.bf16 %v31_v4, %v30_v2  ;;  %267 = vmatprep.mubr.msk.f32.mxu0 %vm32_vm0, %v26_v5  ;;  %v128_v16 = vand.u32 127, %v127_v15  ;;  %v130_v17 = vshrl.u32 %v127_v15, 7  ;;  %24 = vst.msk [vmem:[#allocation3] sm:$0x3] %vm22_vm1, %v299_v25  ;;  %25 = vst.msk [vmem:[#allocation4] sm:$0x3] %vm22_vm1, %v299_v25 }
   0x4   :  { %271 = vmatprep.subr.bf16.mxu0 %v270_v3  ;;  %v237_v5 = vld [vmem:[%s368_s2] sm:$0x3] }
   0x5   :  { %273 = vmatpush3.bf16.msra.mxu0 %v270_v3  ;;  %v131_v19 = vsub.s32 %v128_v16, %v130_v17  ;;  %v154_v30 = vsub.s32 0, %v130_v17  ;;  %v158_v31 = vsub.s32 1, %v130_v17 }
   0x6   :  { %275 = vmatprep.subr.bf16.mxu0 %v274_v6 }
   0x8   :  { %v118_v26 = vld [vmem:[#allocation2] sm:$0x3] }
   0x9   :  { %277 = vmatpush3.bf16.msra.mxu0 %v274_v6 }
   0xa   :  { %v168_v59 = vld [vmem:[#allocation3] sm:$0x3]  ;;  %v194_v62 = vld [vmem:[#allocation4] sm:$0x3] }
   0xc   :  { %268 = vmatmul.mubr.msk.f32.vlgmr.msra.gmra.mrb[0].mxu0 %vm32_vm0, %v27_v7 }
  0xdf   :  { %v269_v10 = vpop.f32.mrb[0].mxu0 }
  0xe0   :  { %v105_v11 = vpop.f32.mrb[1].mxu0  ;;  %v117_v13 = vadd.f32 %v269_v10, %v115_v9 }
  0xe1   :  { %v116_v12 = vadd.f32 %v115_v9, %v105_v11 }
  0xe3   :  { %122 = vperm.xlu0 %282, %v116_v12  }
  0xe7   :  { %125 = vperm.xlu0 %282, %v117_v13  }
  0xeb   :  { %198 = vrot.lane.b32.xlu0 %v105_v11, %s297_s28 }
  0xef   :  { %200 = vrot.lane.b32.xlu0 %v269_v10, %s297_s28 }
 0x162   :  { %v123_v18 = vpop.permute.xlu0 %122 }
 0x163   :  { %v132_v21 = vrot.slane %v123_v18, %v131_v19 }
 0x166   :  { %v126_v20 = vpop.permute.xlu0 %125 }
 0x167   :  { %v136_v22 = vrot.slane %v126_v20, %v131_v19 }
 0x169   :  { %v138_v23 = vsel %vm137_vm2, %v136_v22, %v132_v21 }
 0x16a   :  { %v141_v24 = vsel %vm140_vm3, %v138_v23, -inf  ;;  %v199_v40 = vpop.permute.xlu0 %198 }
 0x16b   :  { %142 = vmax.xlane.f32.xlu1 %v141_v24 }
 0x16e   :  { %v201_v43 = vpop.permute.xlu0 %200 }
 0x1f8   :  { %v143_v27 = vpop.xlane.xlu1 %142 }
 0x1f9   :  { %v144_v28 = vmax.f32 %v118_v26, %v143_v27 }
 0x1fb   :  { %v145_v29 = vsub.f32 %v118_v26, %v144_v28  ;;  %229 = vst.msk [vmem:[#allocation2] sm:$0x3] %vm22_vm1, %v144_v28  ;;  %150 = vperm.xlu1 %283, %v144_v28  }
 0x1fd   :  { %v146_v57 = vmul.f32 1.442695, %v145_v29 }
 0x27a   :  { %v151_v32 = vpop.permute.xlu1 %150 }
 0x27b   :  { %v155_v33 = vrot.slane %v151_v32, %v154_v30  ;;  %v159_v34 = vrot.slane %v151_v32, %v158_v31 }
 0x27d   :  { %v162_v35 = vsub.f32 %v116_v12, %v155_v33  ;;  %v163_v36 = vsub.f32 %v117_v13, %v159_v34 }
 0x27f   :  { %v164_v37 = vmul.f32 1.442695, %v162_v35  ;;  %v166_v38 = vmul.f32 1.442695, %v163_v36 }
 0x281   :  { %284 = vpow2.f32 %v164_v37 }
 0x282   :  { %286 = vpow2.f32 %v166_v38 }
 0x283   :  { %288 = vpow2.f32 %v146_v57 }
 0x28b   :  { %v285_v39 = vpop.eup %284 }
 0x28c   :  { %173 = vperm.xlu0 %282, %v285_v39   ;;  %v204_v41 = vmul.f32 %v285_v39, %v199_v40  ;;  %v287_v42 = vpop.eup %286 }
 0x28d   :  { %v205_v44 = vmul.f32 %v287_v42, %v201_v43  ;;  %v289_v58 = vpop.eup %288 }
 0x28e   :  { %209 = vperm.xlu1 %283, %v204_v41   ;;  %v169_v60 = vmul.f32 %v289_v58, %v168_v59  ;;  %v195_v0 = vmul.f32 %v289_v58, %v194_v62 }
 0x290   :  { %176 = vperm.xlu0 %282, %v287_v42  }
 0x294   :  { %212 = vperm.xlu0 %282, %v205_v44  }
 0x30b   :  { %v174_v45 = vpop.permute.xlu0 %173 }
 0x30c   :  { %v181_v47 = vrot.slane %v174_v45, %v131_v19 }
 0x30d   :  { %v210_v49 = vpop.permute.xlu1 %209 }
 0x30e   :  { %v217_v53 = vrot.slane %v210_v49, %v131_v19 }
 0x30f   :  { %v177_v46 = vpop.permute.xlu0 %176 }
 0x310   :  { %v185_v48 = vrot.slane %v177_v46, %v131_v19 }
 0x312   :  { %v186_v50 = vsel %vm137_vm2, %v185_v48, %v181_v47 }
 0x313   :  { %v213_v51 = vpop.permute.xlu0 %212  ;;  %v188_v52 = vsel %vm140_vm3, %v186_v50, 0.0 }
 0x314   :  { %v221_v54 = vrot.slane %v213_v51, %v131_v19  ;;  %189 = vadd.xlane.f32.xlu1 %v188_v52 }
 0x316   :  { %v222_v55 = vsel %vm137_vm2, %v221_v54, %v217_v53 }
 0x317   :  { %v224_v56 = vsel %vm140_vm3, %v222_v55, 0.0 }
 0x318   :  { %225 = vadd.xlane.f32.xlu0 %v224_v56 }
 0x3a1   :  { %v190_v61 = vpop.xlane.xlu1 %189 }
 0x3a2   :  { %v191_v63 = vadd.f32 %v190_v61, %v169_v60 }
 0x3a4   :  { %193 = vst.msk [vmem:[#allocation3] sm:$0x3] %vm22_vm1, %v191_v63 }
 0x3a5   :  { %v226_v1 = vpop.xlane.xlu0 %225 }
 0x3a6   :  { %v227_v2 = vadd.f32 %v226_v1, %v195_v0 }
 0x3a8   :  { %228 = vst.msk [vmem:[#allocation4] sm:$0x3] %vm22_vm1, %v227_v2 }
 0x3ab   :  { %v234_v3 = vld [vmem:[#allocation3] sm:$0x3] }
 0x3ac   :  { %290 = vrcp.f32 %v234_v3 }
 0x3af   :  { %v233_v6 = vld [vmem:[#allocation4] sm:$0x3] }
 0x3b6   :  { %v291_v4 = vpop.eup %290 }
 0x3b7   :  { %v236_v7 = vmul.f32 %v291_v4, %v233_v6 }
 0x3b9   :  { %v238_v8 = vadd.f32 %v237_v5, %v236_v7 }
 0x3bb   :  { %v252_v9 = vmul.f32 -1.442695, %v238_v8 }
 0x3bd   :  { %292 = vpow2.f32 %v252_v9 }
 0x3c7   :  { %v293_v10 = vpop.eup %292 }
 0x3c8   :  { %v242_v11 = vadd.f32 1.0, %v293_v10 }
 0x3ca   :  { %294 = vrcp.f32 %v242_v11 }
 0x3d4   :  { %v295_v12 = vpop.eup %294 }
 0x3d5   :  { %245 = vst.msk [vmem:[%s369_s4] sm:$0x3] %vm22_vm1, %v295_v12 }

</bundles_post_ra>
